<compile_context>
chip_gen: v6e
topology: v6e:2x2x1
jax: 0.10.0
libtpu: 0.0.40
codegen_flags: <defaults>
</compile_context>

<pallas_src>
import functools

import jax
import jax.numpy as jnp
from jax.experimental import pallas as pl
from jax.experimental.pallas import tpu as pltpu


def irg_head_kernel(x_ref, w1_ref, b1_ref, w2_ref, b2_ref, o_ref):
    """relu(x @ w1 + b1) @ w2 + b2 for one row tile; weights resident in VMEM."""
    # In-kernel f32 -> bf16 cast of activations (free in a memory-bound kernel).
    x = x_ref[...].astype(jnp.bfloat16)
    h = jnp.dot(x, w1_ref[...], preferred_element_type=jnp.float32)       # MXU, f32 acc
    h = jnp.maximum(h + b1_ref[...], 0.0)                                 # bias + ReLU (f32, VPU)
    o = jnp.dot(h.astype(jnp.bfloat16), w2_ref[...],
                preferred_element_type=jnp.float32)                       # MXU, f32 acc
    o_ref[...] = (o + b2_ref[...]).astype(o_ref.dtype)


def prepare_params(w1, b1, w2, b2):
    """One-time parameter prep (do NOT redo per call): bf16 weights, (1,hid) f32 biases."""
    hid = w1.shape[1]
    return (w1.astype(jnp.bfloat16),
            b1.astype(jnp.float32).reshape(1, hid),
            w2.astype(jnp.bfloat16),
            b2.astype(jnp.float32).reshape(1, hid))


@functools.partial(jax.jit, static_argnames=("tm", "single_shot_rows", "out_dtype"))
def irg_head_forward(roi_feats, w1b, b1f, w2b, b2f, *,
                     tm=1024, single_shot_rows=2048, out_dtype=None):
    """Two-layer MLP head.  roi_feats: (N, dim) f32; w1b: (dim, hid) bf16; w2b: (hid, hid) bf16."""
    N, dim = roi_feats.shape
    hid = w1b.shape[1]
    if out_dtype is None:
        out_dtype = roi_feats.dtype  # set out_dtype=jnp.bfloat16 to halve the output stream
    out_itemsize = jnp.dtype(out_dtype).itemsize

    cost = pl.CostEstimate(
        flops=2 * N * (dim * hid + hid * hid),
        transcendentals=0,
        bytes_accessed=(N * dim * roi_feats.dtype.itemsize      # x read
                        + N * hid * out_itemsize                # out write
                        + (dim * hid + hid * hid) * 2           # bf16 weights (read once)
                        + 2 * hid * 4),                         # f32 biases
    )

    if N <= single_shot_rows:
        # Small-N path: no grid at all — every operand is a full-extent VMEM
        # block; no pipeline machinery, no double-buffering of tiny weights.
        return pl.pallas_call(
            irg_head_kernel,
            out_shape=jax.ShapeDtypeStruct((N, hid), out_dtype),
            in_specs=[pl.BlockSpec(memory_space=pltpu.MemorySpace.VMEM)] * 5,
            out_specs=pl.BlockSpec(memory_space=pltpu.MemorySpace.VMEM),
            cost_estimate=cost,
        )(roi_feats, w1b, b1f, w2b, b2f)

    # Large-N path: 1-D grid over row tiles; no host-side pad and no out[:N]
    # slice — Pallas handles the ragged last block.  Weights/biases use a
    # constant index_map so they are fetched once and stay resident; the row
    # axis is "parallel" so v7x megacore splits the tiles across its two TCs.
    grid = (pl.cdiv(N, tm),)
    return pl.pallas_call(
        irg_head_kernel,
        out_shape=jax.ShapeDtypeStruct((N, hid), out_dtype),
        grid=grid,
        in_specs=[
            pl.BlockSpec((tm, dim), lambda i: (i, 0)),     # x: tiled over rows
            pl.BlockSpec((dim, hid), lambda i: (0, 0)),    # w1: resident (DMA'd once)
            pl.BlockSpec((1, hid), lambda i: (0, 0)),      # b1: resident
            pl.BlockSpec((hid, hid), lambda i: (0, 0)),    # w2: resident
            pl.BlockSpec((1, hid), lambda i: (0, 0)),      # b2: resident
        ],
        out_specs=pl.BlockSpec((tm, hid), lambda i: (i, 0)),
        compiler_params=pltpu.CompilerParams(
            dimension_semantics=("parallel",)),
        cost_estimate=cost,
    )(roi_feats, w1b, b1f, w2b, b2f)


def irg_head_reference(roi_feats, w1, b1, w2, b2):
    """Pure-JAX reference emulating the kernel's bf16 operand rounding."""
    x = roi_feats.astype(jnp.bfloat16).astype(jnp.float32)
    w1c = w1.astype(jnp.bfloat16).astype(jnp.float32)
    w2c = w2.astype(jnp.bfloat16).astype(jnp.float32)
    h = jnp.maximum(x @ w1c + b1.reshape(1, -1), 0.0)
    h = h.astype(jnp.bfloat16).astype(jnp.float32)
    return (h @ w2c + b2.reshape(1, -1)).astype(roi_feats.dtype)


def make_params(key, dim, hid):
    """Deterministic synthetic init (PyTorch-Linear-like uniform fan-in scaling)."""
    k1, k2, k3, k4 = jax.random.split(key, 4)
    bound1 = 1.0 / jnp.sqrt(dim)
    bound2 = 1.0 / jnp.sqrt(hid)
    # Stored as (in, out) == W^T relative to nn.Linear's (out, in).
    w1 = jax.random.uniform(k1, (dim, hid), jnp.float32, -bound1, bound1)
    b1 = jax.random.uniform(k2, (hid,), jnp.float32, -bound1, bound1)
    w2 = jax.random.uniform(k3, (hid, hid), jnp.float32, -bound2, bound2)
    b2 = jax.random.uniform(k4, (hid,), jnp.float32, -bound2, bound2)
    return w1, b1, w2, b2


if __name__ == "__main__":
    key = jax.random.PRNGKey(0)
    kx1, kx2, kp = jax.random.split(key, 3)

    dim, hid = 32, 256  # backbone.out_channels = 32; hid fixed at 256 by the module
    w1, b1, w2, b2 = make_params(kp, dim, hid)
    params = prepare_params(w1, b1, w2, b2)  # bf16 weights / (1,hid) f32 biases, once

    # Path 1: small ROI batch -> no-grid, fully VMEM-resident path.
    N_small = 8
    roi_small = jax.random.normal(kx1, (N_small, dim), jnp.float32)
    out_small = jax.block_until_ready(irg_head_forward(roi_small, *params))
    ref_small = irg_head_reference(roi_small, w1, b1, w2, b2)
    assert out_small.shape == (N_small, hid)
    assert jnp.allclose(out_small, ref_small, atol=2e-3, rtol=2e-3), \
        "small-path mismatch vs reference"

    # Path 2: row-tiled grid with a ragged last tile (forced with a small tm so
    # test shapes stay small; production defaults are tm=1024, single_shot_rows=2048).
    N_big = 300
    roi_big = jax.random.normal(kx2, (N_big, dim), jnp.float32)
    out_big = jax.block_until_ready(
        irg_head_forward(roi_big, *params, tm=128, single_shot_rows=64))
    ref_big = irg_head_reference(roi_big, w1, b1, w2, b2)
    assert out_big.shape == (N_big, hid)
    assert jnp.allclose(out_big, ref_big, atol=2e-3, rtol=2e-3), \
        "tiled-path mismatch vs reference"

    print("KERNEL_OK")
</pallas_src>

<mosaic_0001>
module attributes {stable_mosaic.version = 11 : i64} {
  func.func @irg_head_kernel(%arg0: memref<8x32xf32, #tpu.memory_space<vmem>>, %arg1: memref<32x256xbf16, #tpu.memory_space<vmem>>, %arg2: memref<1x256xf32, #tpu.memory_space<vmem>>, %arg3: memref<256x256xbf16, #tpu.memory_space<vmem>>, %arg4: memref<1x256xf32, #tpu.memory_space<vmem>>, %arg5: memref<8x256xf32, #tpu.memory_space<vmem>>) attributes {dimension_semantics = [], scalar_prefetch = 0 : i64, scratch_operands = 0 : i64, tpu.core_type = #tpu.core_type<tc>} {
    %c0 = arith.constant 0 : index
    %c0_0 = arith.constant 0 : index
    %0 = vector.load %arg0[%c0, %c0_0] : memref<8x32xf32, #tpu.memory_space<vmem>>, vector<8x32xf32>
    %1 = arith.truncf %0 : vector<8x32xf32> to vector<8x32xbf16>
    %c0_1 = arith.constant 0 : index
    %c0_2 = arith.constant 0 : index
    %2 = vector.load %arg1[%c0_1, %c0_2] : memref<32x256xbf16, #tpu.memory_space<vmem>>, vector<32x256xbf16>
    %cst = arith.constant dense<0.000000e+00> : vector<8x256xf32>
    %3 = tpu.matmul %1, %2, %cst {dimension_numbers = #tpu.dot_dimension_numbers<[1], [0], [0], [1], [0, 0, 1, 1], [], []>} : vector<8x32xbf16>, vector<32x256xbf16>, vector<8x256xf32> -> vector<8x256xf32>
    %c0_3 = arith.constant 0 : index
    %c0_4 = arith.constant 0 : index
    %4 = vector.load %arg2[%c0_3, %c0_4] : memref<1x256xf32, #tpu.memory_space<vmem>>, vector<1x256xf32>
    %5 = vector.broadcast %4 : vector<1x256xf32> to vector<8x256xf32>
    %6 = arith.addf %3, %5 : vector<8x256xf32>
    %cst_5 = arith.constant 0.000000e+00 : f32
    %7 = vector.broadcast %cst_5 : f32 to vector<8x256xf32>
    %8 = arith.maximumf %6, %7 : vector<8x256xf32>
    %9 = arith.truncf %8 : vector<8x256xf32> to vector<8x256xbf16>
    %c0_6 = arith.constant 0 : index
    %c0_7 = arith.constant 0 : index
    %10 = vector.load %arg3[%c0_6, %c0_7] : memref<256x256xbf16, #tpu.memory_space<vmem>>, vector<256x256xbf16>
    %cst_8 = arith.constant dense<0.000000e+00> : vector<8x256xf32>
    %11 = tpu.matmul %9, %10, %cst_8 {dimension_numbers = #tpu.dot_dimension_numbers<[1], [0], [0], [1], [0, 0, 1, 1], [], []>} : vector<8x256xbf16>, vector<256x256xbf16>, vector<8x256xf32> -> vector<8x256xf32>
    %c0_9 = arith.constant 0 : index
    %c0_10 = arith.constant 0 : index
    %12 = vector.load %arg4[%c0_9, %c0_10] : memref<1x256xf32, #tpu.memory_space<vmem>>, vector<1x256xf32>
    %13 = vector.broadcast %12 : vector<1x256xf32> to vector<8x256xf32>
    %14 = arith.addf %11, %13 : vector<8x256xf32>
    %c0_11 = arith.constant 0 : index
    %c0_12 = arith.constant 0 : index
    %15 = vector.load %arg5[%c0_11, %c0_12] : memref<8x256xf32, #tpu.memory_space<vmem>>, vector<8x256xf32>
    tpu.vector_store %arg5[%c0_11, %c0_12], %14 {strides = array<i32>} : memref<8x256xf32, #tpu.memory_space<vmem>>, vector<8x256xf32>,
    return
  }
}

</mosaic_0001>

<bundles_post_ra>
// kernel: irg_head_forward.1
= control target key start
LH: loop header
LB: loop body
LE: loop exit
PB: predicated region body
PF: predicated region fallthrough
CT: control target
= control target key end

     0   :  { %10 = vsyncpa [#allocation3], 0  ;;  %s650_s0 = inlined_call_operand.hbm [shape: f32[8,32], index: 0, kind: input, shape index: {}]   ;;  %s651_s1 = inlined_call_operand.hbm [shape: bf16[32,256], index: 1, kind: input, shape index: {}]   ;;  %s652_s2 = inlined_call_operand.vmem [shape: f32[1,256], index: 2, kind: input, shape index: {}]   ;;  %s653_s3 = inlined_call_operand.hbm [shape: bf16[256,256], index: 3, kind: input, shape index: {}]   ;;  %s654_s4 = inlined_call_operand.vmem [shape: f32[1,256], index: 4, kind: input, shape index: {}]   ;;  %s655_s5 = inlined_call_operand.hbm [shape: f32[8,256], index: 5, kind: output, shape index: {}]  }
   0x1   :  { %11 = vsyncpa [#allocation6], 0 }
   0x2   :  { %12 = vsyncpa [#allocation4], 0  ;;  %s595_s18 = smov [#allocation5]  }
   0x3   :  { %s28_s19 = sshll.u32 %s595_s18, 4  ;;  %s29_s19 = int_to_ptr.vmem [resolvable:$true] %s28_s19 }
   0x4   :  { %s517_s20 = scalar_lea.vmem %s29_s19, 512  ;;  %p522_p1 = scmp.lt.s32.totalorder %s29_s19, %s29_s19 }
   0x5   :  { %p518_p0 = scmp.ne.s32.totalorder %s29_s19, %s517_s20  ;;  %p523_p2 = scmp.lt.s32.totalorder %s517_s20, %s517_s20 }
   0x7   :  { %p524_p3 = por %p523_p2, %p522_p1 }
   0x9   :  { %p525_p4 = pnand %p524_p3, %p518_p0 }
   0xb   :  { %528 = shalt.err (!%p525_p4)
}
   0xc   :  { %s596_s21 = smov 128   ;;  %s597_s22 = smov 8  }
   0xd   :  { %34 = dma.hbm_to_vmem [thread:$0]  %s651_s1, 512, %s29_s19, [#allocation6], %s596_s21, %s596_s21, %s597_s22  }
   0xe   :  { %s598_s25 = smov [#allocation2]   ;;  %s599_s27 = smov [#allocation7]  }
   0xf   :  { %s19_s26 = sshll.u32 %s598_s25, 4  ;;  %s42_s28 = sshll.u32 %s599_s27, 4  ;;  %s20_s26 = int_to_ptr.vmem [resolvable:$true] %s19_s26  ;;  %s43_s28 = int_to_ptr.vmem [resolvable:$true] %s42_s28 }
  0x10   :  { %s537_s29 = scalar_lea.vmem %s20_s26, 128  ;;  %p542_p6 = scmp.lt.s32.totalorder %s20_s26, %s20_s26 }
  0x11   :  { %p538_p5 = scmp.ne.s32.totalorder %s20_s26, %s537_s29  ;;  %p543_p7 = scmp.lt.s32.totalorder %s537_s29, %s537_s29 }
  0x13   :  { %p544_p8 = por %p543_p7, %p542_p6 }
  0x15   :  { %p545_p9 = pnand %p544_p8, %p538_p5 }
  0x17   :  { %548 = shalt.err (!%p545_p9)
}
  0x18   :  { %22 = dma.hbm_to_vmem [thread:$0]  %s650_s0, 128, %s20_s26, [#allocation3]  }
  0x19   :  { %s557_s7 = scalar_lea.vmem %s43_s28, 4096  ;;  %p562_p11 = scmp.lt.s32.totalorder %s43_s28, %s43_s28 }
  0x1a   :  { %p558_p10 = scmp.ne.s32.totalorder %s43_s28, %s557_s7  ;;  %p563_p12 = scmp.lt.s32.totalorder %s557_s7, %s557_s7 }
  0x1c   :  { %p564_p13 = por %p563_p12, %p562_p11 }
  0x1e   :  { %p565_p0 = pnand %p564_p13, %p558_p10 }
  0x20   :  { %568 = shalt.err (!%p565_p0)
}
  0x21   :  { %48 = dma.hbm_to_vmem [thread:$0]  %s653_s3, 4096, %s43_s28, [#allocation6], %s596_s21, %s596_s21, %s597_s22  }
  0x22   :  { %589 = dma.done.wait [#allocation3], 128  }
  0x23   :  { %590 = vsyncadd [#allocation3], 4294967168 }
  0x24   :  { %591 = dma.done.wait [#allocation6], 4608  }
  0x25   :  { %592 = vsyncadd [#allocation6], 4294962688  ;;  %v600_v0 = vmov 0   ;;  %v455_v1 = vld [vmem:[#allocation5 + $0x14] ss:$8 sps:$4 sm:$0xff]   ;;  %vm99_vm0 = vcmask 261120   ;;  %v69_v39 = vlaneseq }
  0x26   :  { %135 = vmatprep.mubr.bf16.mxu0 %v600_v0  ;;  %v457_v2 = vld [vmem:[#allocation5 + $0x10] ss:$8 sps:$4 sm:$0xff]   ;;  %115 = vmatprep.subr.bf16.mxu0 %v455_v1  ;;  %v458_v3 = vld [vmem:[#allocation5 + $0x4] ss:$8 sps:$4 sm:$0xff]   ;;  %v460_v4 = vld [vmem:[#allocation5] ss:$8 sps:$4 sm:$0xff]  }
  0x27   :  { %v61_v5 = vld [vmem:[#allocation2] sm:$0xff]  ;;  %116 = vmatpush1.bf16.msra.mxu0 %v457_v2  ;;  %v464_v8 = vld [vmem:[#allocation7 + $0x64] ss:$8 sps:$4 sm:$0xff]   ;;  %v466_v10 = vld [vmem:[#allocation7 + $0x60] ss:$8 sps:$4 sm:$0xff]   ;;  %v70_v40 = vshrl.u32 %v69_v39, 7 }
  0x28   :  { %v461_v6 = vld [vmem:[#allocation7 + $0x74] ss:$8 sps:$4 sm:$0xff]   ;;  %117 = vmatprep.subr.bf16.mxu0 %v458_v3  ;;  %v463_v7 = vld [vmem:[#allocation7 + $0x70] ss:$8 sps:$4 sm:$0xff]   ;;  %v62_v9 = vpack.c.bf16 %v61_v5, %v61_v5  ;;  %v470_v13 = vld [vmem:[#allocation7 + $0x44] ss:$8 sps:$4 sm:$0xff]  }
  0x29   :  { %352 = vmatprep.subr.bf16.mxu1 %v461_v6  ;;  %v467_v11 = vld [vmem:[#allocation7 + $0x54] ss:$8 sps:$4 sm:$0xff]   ;;  %v469_v12 = vld [vmem:[#allocation7 + $0x50] ss:$8 sps:$4 sm:$0xff]   ;;  %v472_v14 = vld [vmem:[#allocation7 + $0x40] ss:$8 sps:$4 sm:$0xff]  }
  0x2a   :  { %353 = vmatpush1.bf16.msra.mxu1 %v463_v7  ;;  %v473_v15 = vld [vmem:[#allocation7 + $0x34] ss:$8 sps:$4 sm:$0xff]   ;;  %v475_v16 = vld [vmem:[#allocation7 + $0x30] ss:$8 sps:$4 sm:$0xff]   ;;  %v476_v17 = vld [vmem:[#allocation7 + $0x24] ss:$8 sps:$4 sm:$0xff]  }
  0x2b   :  { %118 = vmatpush1.bf16.msra.mxu0 %v460_v4  ;;  %354 = vmatprep.subr.bf16.mxu1 %v464_v8  ;;  %v478_v18 = vld [vmem:[#allocation7 + $0x20] ss:$8 sps:$4 sm:$0xff]   ;;  %v479_v19 = vld [vmem:[#allocation7 + $0x14] ss:$8 sps:$4 sm:$0xff]   ;;  %v481_v20 = vld [vmem:[#allocation7 + $0x10] ss:$8 sps:$4 sm:$0xff]  }
  0x2c   :  { %v482_v21 = vld [vmem:[#allocation7 + $0x4] ss:$8 sps:$4 sm:$0xff]   ;;  %v484_v22 = vld [vmem:[#allocation7] ss:$8 sps:$4 sm:$0xff]   ;;  %v485_v23 = vld [vmem:[#allocation7 + $0xf4] ss:$8 sps:$4 sm:$0xff]  }
  0x2d   :  { %v487_v24 = vld [vmem:[#allocation7 + $0xf0] ss:$8 sps:$4 sm:$0xff]   ;;  %v488_v25 = vld [vmem:[#allocation7 + $0xe4] ss:$8 sps:$4 sm:$0xff]   ;;  %v490_v26 = vld [vmem:[#allocation7 + $0xe0] ss:$8 sps:$4 sm:$0xff]  }
  0x2e   :  { %415 = vmatmul.mubr.msk.bf16.vlgmr.msra.gmra.mxu0 %vm99_vm0, %v62_v9  ;;  %355 = vmatpush1.bf16.msra.mxu1 %v466_v10  ;;  %v491_v27 = vld [vmem:[#allocation7 + $0xd4] ss:$8 sps:$4 sm:$0xff]   ;;  %v493_v28 = vld [vmem:[#allocation7 + $0xd0] ss:$8 sps:$4 sm:$0xff]   ;;  %v494_v29 = vld [vmem:[#allocation7 + $0xc4] ss:$8 sps:$4 sm:$0xff]  }
  0x2f   :  { %356 = vmatprep.subr.bf16.mxu1 %v467_v11  ;;  %v496_v30 = vld [vmem:[#allocation7 + $0xc0] ss:$8 sps:$4 sm:$0xff]   ;;  %v497_v31 = vld [vmem:[#allocation7 + $0xb4] ss:$8 sps:$4 sm:$0xff]   ;;  %v499_v32 = vld [vmem:[#allocation7 + $0xb0] ss:$8 sps:$4 sm:$0xff]  }
  0x30   :  { %v500_v33 = vld [vmem:[#allocation7 + $0xa4] ss:$8 sps:$4 sm:$0xff]   ;;  %v502_v34 = vld [vmem:[#allocation7 + $0xa0] ss:$8 sps:$4 sm:$0xff]   ;;  %v503_v35 = vld [vmem:[#allocation7 + $0x94] ss:$8 sps:$4 sm:$0xff]  }
  0x31   :  { %v505_v36 = vld [vmem:[#allocation7 + $0x90] ss:$8 sps:$4 sm:$0xff]   ;;  %v506_v37 = vld [vmem:[#allocation7 + $0x84] ss:$8 sps:$4 sm:$0xff]   ;;  %v508_v38 = vld [vmem:[#allocation7 + $0x80] ss:$8 sps:$4 sm:$0xff]  }
  0x32   :  { %357 = vmatpush1.bf16.msra.mxu1 %v469_v12  ;;  %v71_v41 = vsub.s32 0, %v70_v40  ;;  %v67_v42 = vld [vmem:[%s652_s2] sm:$0x3]  ;;  %v75_v43 = vsub.s32 1, %v70_v40  ;;  %s601_s2 = smov [#allocation8]  }
  0x33   :  { %358 = vmatprep.subr.bf16.mxu1 %v470_v13  ;;  %v180_v56 = vld [vmem:[%s654_s4] sm:$0x3]  ;;  %s401_s11 = sshll.u32 %s601_s2, 4  ;;  %s402_s11 = int_to_ptr.vmem [resolvable:$true] %s401_s11 }
  0x34   :  { %v72_v44 = vrot.slane %v67_v42, %v71_v41  ;;  %v76_v45 = vrot.slane %v67_v42, %v75_v43  ;;  %v185_v57 = vrot.slane %v180_v56, %v71_v41  ;;  %v189_v58 = vrot.slane %v180_v56, %v75_v43  ;;  %s569_s12 = scalar_lea.vmem %s402_s11, 256  ;;  %p574_p2 = scmp.lt.s32.totalorder %s402_s11, %s402_s11 }
  0x35   :  { %p570_p1 = scmp.ne.s32.totalorder %s402_s11, %s569_s12  ;;  %p575_p3 = scmp.lt.s32.totalorder %s569_s12, %s569_s12 }
  0x36   :  { %359 = vmatpush1.bf16.msra.mxu1 %v472_v14 }
  0x37   :  { %360 = vmatprep.subr.bf16.mxu1 %v473_v15  ;;  %p576_p4 = por %p575_p3, %p574_p2 }
  0x39   :  { %p577_p5 = pnand %p576_p4, %p570_p1 }
  0x3a   :  { %361 = vmatpush1.bf16.msra.mxu1 %v475_v16 }
  0x3b   :  { %362 = vmatprep.subr.bf16.mxu1 %v476_v17 }
  0x3e   :  { %363 = vmatpush1.bf16.msra.mxu1 %v478_v18 }
  0x3f   :  { %364 = vmatprep.subr.bf16.mxu1 %v479_v19 }
  0x42   :  { %365 = vmatpush1.bf16.msra.mxu1 %v481_v20 }
  0x43   :  { %366 = vmatprep.subr.bf16.mxu1 %v482_v21 }
  0x46   :  { %367 = vmatpush1.bf16.msra.mxu1 %v484_v22 }
  0x47   :  { %368 = vmatprep.subr.bf16.mxu1 %v485_v23 }
  0x4a   :  { %369 = vmatpush2.bf16.msra.mxu1 %v487_v24 }
  0x4b   :  { %370 = vmatprep.subr.bf16.mxu1 %v488_v25 }
  0x4e   :  { %371 = vmatpush2.bf16.msra.mxu1 %v490_v26 }
  0x4f   :  { %372 = vmatprep.subr.bf16.mxu1 %v491_v27 }
  0x52   :  { %373 = vmatpush2.bf16.msra.mxu1 %v493_v28 }
  0x53   :  { %374 = vmatprep.subr.bf16.mxu1 %v494_v29 }
  0x56   :  { %375 = vmatpush2.bf16.msra.mxu1 %v496_v30 }
  0x57   :  { %376 = vmatprep.subr.bf16.mxu1 %v497_v31 }
  0x5a   :  { %377 = vmatpush2.bf16.msra.mxu1 %v499_v32 }
  0x5b   :  { %378 = vmatprep.subr.bf16.mxu1 %v500_v33 }
  0x5e   :  { %379 = vmatpush2.bf16.msra.mxu1 %v502_v34 }
  0x5f   :  { %380 = vmatprep.subr.bf16.mxu1 %v503_v35 }
  0x62   :  { %381 = vmatpush2.bf16.msra.mxu1 %v505_v36 }
  0x63   :  { %382 = vmatprep.subr.bf16.mxu1 %v506_v37 }
  0x66   :  { %383 = vmatpush2.bf16.msra.mxu1 %v508_v38 }
  0xee   :  { %v137_v46 = vpop.f32.mrf.mxu0 }
  0xef   :  { %v138_v47 = vadd.f32 %v137_v46, %v72_v44 }
  0xf0   :  { %v139_v48 = vpop.f32.mrf.mxu0 }
  0xf1   :  { %v140_v49 = vadd.f32 %v139_v48, %v76_v45  ;;  %v144_v50 = vmax.f32 %v138_v47, 0.0 }
  0xf2   :  { %v141_v51 = vpop.f32.mrf.mxu0 }
  0xf3   :  { %v145_v52 = vmax.f32 %v140_v49, 0.0  ;;  %v146_v55 = vpack.c.bf16 %v144_v50, %v144_v50 }
  0xf4   :  { %v142_v53 = vpop.f32.mrf.mxu0 }
  0xf5   :  { %v147_v54 = vpack.c.bf16 %v145_v52, %v145_v52 }
  0xf7   :  { %384 = vmatprep.mubr.bf16.mxu1 %v147_v54 }
  0xf8   :  { %385 = vmatmul.mubr.bf16.vlgmr.msra.gmra.mxu1 %v146_v55 }
 0x1b8   :  { %v386_v59 = vpop.f32.mrf.mxu1 }
 0x1b9   :  { %v387_v60 = vadd.f32 %v386_v59, %v185_v57 }
 0x1ba   :  { %v388_v61 = vpop.f32.mrf.mxu1 }
 0x1bb   :  { %393 = vst [vmem:[#allocation8] sm:$0xff] %v387_v60  ;;  %v389_v62 = vadd.f32 %v388_v61, %v189_v58 }
 0x1bc   :  { %v390_v63 = vpop.f32.mrf.mxu1 }
 0x1bd   :  { %394 = vst [vmem:[#allocation8 + $0x8] sm:$0xff] %v389_v62 }
 0x1be   :  { %v391_v0 = vpop.f32.mrf.mxu1 }
 0x1bf   :  { %580 = shalt.err (!%p577_p5)
}
 0x1c0   :  { %404 = dma.vmem_to_hbm [thread:$0]  %s402_s11, 256, %s655_s5, [#allocation4]  }
 0x1c1   :  { %593 = dma.done.wait [#allocation4], 256  }
 0x1c2   :  { %594 = vsyncadd [#allocation4], 4294967040 }
 0x1c3   :  { %408 = vsyncpa [#allocation3], 1 }
 0x1c4   :  { %409 = vsyncpa [#allocation6], 1 }
 0x1c5   :  { %410 = vsyncpa [#allocation4], 1 }

</bundles_post_ra>
